<compile_context>
chip_gen: v7x
topology: tpu7x:2x2x1
jax: 0.10.0
libtpu: 0.0.40
codegen_flags: <defaults>
</compile_context>

<pallas_src>
import functools

import jax
import jax.numpy as jnp
from jax.experimental import pallas as pl
from jax.experimental.pallas import tpu as pltpu

LN_EPS = 1e-5  # torch.nn.LayerNorm default


def _layernorm_fused(h, gamma, beta):
    # Single cross-lane reduce pass: sum and sum-of-squares (f32),
    # var = E[h^2] - mu^2, clamped at 0 against cancellation.
    n = h.shape[-1]
    s1 = jnp.sum(h, axis=-1, keepdims=True)
    s2 = jnp.sum(h * h, axis=-1, keepdims=True)
    mu = s1 * (1.0 / n)
    var = jnp.maximum(s2 * (1.0 / n) - mu * mu, 0.0)
    return (h - mu) * jax.lax.rsqrt(var + LN_EPS) * gamma + beta


def residual_block_kernel(x_ref, w1_ref, b1_ref, g1_ref, bt1_ref,
                          w2_ref, b2_ref, g2_ref, bt2_ref, o_ref):
    # x is streamed as bf16; LN / accumulation / residual math stays in f32.
    x_bf = x_ref[...]                                        # (tb, H) bf16

    # fc1: bf16 MXU operands, f32 accumulation -> LayerNorm -> ReLU.
    h = jnp.dot(x_bf, w1_ref[...], preferred_element_type=jnp.float32) + b1_ref[...]
    h = jnp.maximum(_layernorm_fused(h, g1_ref[...], bt1_ref[...]), 0.0)

    # fc2 -> LayerNorm.
    h = jnp.dot(h.astype(jnp.bfloat16), w2_ref[...],
                preferred_element_type=jnp.float32) + b2_ref[...]
    h = _layernorm_fused(h, g2_ref[...], bt2_ref[...])

    # Residual add + ReLU.  Re-read x from VMEM here (cheap vld hidden under
    # MXU work) instead of keeping it live in vregs across both matmuls.
    o_ref[...] = jnp.maximum(h + x_ref[...].astype(jnp.float32),
                             0.0).astype(o_ref.dtype)


def _choose_batch_tile(B, tile_b):
    tb = min(tile_b, B)
    # Keep >= 2 grid steps when the batch allows so the "parallel" batch axis
    # can be sharded across both TensorCores on v7x (harmless on v5e/v6e).
    if B >= 16 and B // tb < 2:
        tb = B // 2
    tb = max(8, (tb // 8) * 8)  # sublane-aligned
    return tb


def _vmem_cap_bytes():
    # Generation-aware ceiling: physical VMEM minus headroom for f32/bf16
    # temporaries and Mosaic internal scratch (~48 MiB on v7x, ~100 MiB v5e/v6e).
    try:
        phys = pltpu.get_tpu_info().vmem_capacity_bytes
    except Exception:
        phys = 64 * 1024 * 1024  # conservative (v7x-sized) fallback
    return min(phys - 16 * 1024 * 1024, (phys * 4) // 5)


@functools.partial(jax.jit, static_argnames=("tile_b",))
def residual_block(x, w1, b1, g1, bt1, w2, b2, g2, bt2, *, tile_b=512):
    """Fused fc1 -> LN -> ReLU -> fc2 -> LN -> +x -> ReLU.

    x: (B, H).  w1/w2: (H, H) pre-transposed to (in, out), bf16.
    b*/g*/bt*: (1, H) f32.  x/out are streamed in bf16 (the kernel is
    HBM-bandwidth bound once weights are resident); LN, accumulation and the
    residual add are computed in f32 inside the kernel.
    """
    B, H = x.shape
    assert H % 128 == 0, "hidden dim must be lane-dense (multiple of 128)"
    tb = _choose_batch_tile(B, tile_b)

    # Ragged batches: pad to a multiple of the batch tile, slice afterwards.
    Bp = ((B + tb - 1) // tb) * tb
    x_io = x.astype(jnp.bfloat16)
    if Bp != B:
        x_io = jnp.pad(x_io, ((0, Bp - B), (0, 0)))
    grid = (Bp // tb,)

    # Streamed bf16 tiles (double-buffered by default).  If input DMA is
    # exposed at very small H, consider pipeline_mode=pl.Buffered(3) here.
    x_spec = pl.BlockSpec((tb, H), lambda i: (i, 0))
    # Weights / params: constant index_map -> VMEM-resident across the grid;
    # single-buffered so the pipeliner doesn't allocate a ghost second copy.
    w_spec = pl.BlockSpec((H, H), lambda i: (0, 0), pipeline_mode=pl.Buffered(1))
    v_spec = pl.BlockSpec((1, H), lambda i: (0, 0), pipeline_mode=pl.Buffered(1))

    # VMEM budget: single-buffered resident weights/params + double-buffered
    # bf16 x/out tiles + kernel temporaries (f32 h, f32 x upcast, bf16 h cast),
    # with 1.5x margin, capped under this generation's physical VMEM.
    resident = 2 * H * H * w1.dtype.itemsize + 6 * H * 4
    streamed = 2 * 2 * tb * H * 2
    temps = tb * H * (4 + 4 + 2)
    vmem_limit = max(int(1.5 * (resident + streamed + temps)), 32 * 1024 * 1024)
    vmem_limit = int(min(vmem_limit, _vmem_cap_bytes()))
    # TODO(synk): for H too large for weight-resident VMEM (hit ~2x earlier on
    # v7x's 64 MiB), add a K/N-tiled 3-D-grid path with an f32 VMEM accumulator.
    # TODO(synk): optional int8 (v5e/v6e) / fp8 (v7x) weight variant with
    # per-channel scales folded into the bias for MXU-bound large-H configs.

    out = pl.pallas_call(
        residual_block_kernel,
        out_shape=jax.ShapeDtypeStruct((Bp, H), jnp.bfloat16),
        grid=grid,
        in_specs=[x_spec, w_spec, v_spec, v_spec, v_spec,
                  w_spec, v_spec, v_spec, v_spec],
        out_specs=x_spec,
        compiler_params=pltpu.CompilerParams(
            dimension_semantics=("parallel",),
            vmem_limit_bytes=vmem_limit,
        ),
    )(x_io, w1, b1, g1, bt1, w2, b2, g2, bt2)
    return out[:B] if Bp != B else out


def _init_linear(key, h):
    # Deterministic init mimicking torch.nn.Linear default (uniform +/- 1/sqrt(h)).
    kw, kb = jax.random.split(key)
    bound = 1.0 / (h ** 0.5)
    w = jax.random.uniform(kw, (h, h), jnp.float32, -bound, bound)  # (out, in)
    b = jax.random.uniform(kb, (h,), jnp.float32, -bound, bound)
    return w, b


def _reference(x, w1, b1, g1, bt1, w2, b2, g2, bt2):
    def ln(h, g, bt):
        mu = jnp.mean(h, axis=-1, keepdims=True)
        var = jnp.mean((h - mu) ** 2, axis=-1, keepdims=True)
        return (h - mu) / jnp.sqrt(var + LN_EPS) * g + bt

    h = jnp.maximum(ln(x @ w1 + b1, g1, bt1), 0.0)
    h = ln(h @ w2 + b2, g2, bt2)
    return jnp.maximum(h + x, 0.0)


if __name__ == "__main__":
    B, H = 256, 128  # lane-dense hidden dim; tile clamp keeps a 2-step grid
    key = jax.random.PRNGKey(0)
    kx, k1, k2, kg1, kb1, kg2, kb2 = jax.random.split(key, 7)

    x = jax.random.normal(kx, (B, H), jnp.float32)

    w1_oi, b1 = _init_linear(k1, H)  # torch layout (out, in)
    w2_oi, b2 = _init_linear(k2, H)

    # LayerNorm affine params (torch default gamma=1, beta=0; perturb to
    # exercise the affine path).
    g1 = 1.0 + 0.1 * jax.random.normal(kg1, (1, H), jnp.float32)
    bt1 = 0.1 * jax.random.normal(kb1, (1, H), jnp.float32)
    g2 = 1.0 + 0.1 * jax.random.normal(kg2, (1, H), jnp.float32)
    bt2 = 0.1 * jax.random.normal(kb2, (1, H), jnp.float32)

    # Pre-transpose weights to (in, out) and cast to bf16 MXU operands.
    w1 = w1_oi.T.astype(jnp.bfloat16)
    w2 = w2_oi.T.astype(jnp.bfloat16)
    b1_2d = b1.reshape(1, H)
    b2_2d = b2.reshape(1, H)

    out = residual_block(x, w1, b1_2d, g1, bt1, w2, b2_2d, g2, bt2)
    out = jax.block_until_ready(out)

    # Reference in f32 using the same bf16-rounded x and weights (remaining
    # delta is the documented bf16 activation / bf16-output trade-off).
    x_r = x.astype(jnp.bfloat16).astype(jnp.float32)
    ref = _reference(x_r, w1.astype(jnp.float32), b1_2d, g1, bt1,
                     w2.astype(jnp.float32), b2_2d, g2, bt2)
    assert out.shape == (B, H) and out.dtype == jnp.bfloat16
    assert jnp.allclose(out.astype(jnp.float32), ref, atol=3e-2, rtol=3e-2), \
        "mismatch vs JAX reference"

    print("KERNEL_OK")
</pallas_src>

<mosaic_0001>
module attributes {stable_mosaic.version = 11 : i64} {
  func.func @residual_block_kernel(%arg0: i32, %arg1: memref<128x128xbf16, #tpu.memory_space<vmem>>, %arg2: memref<128x128xbf16, #tpu.memory_space<vmem>>, %arg3: memref<1x128xf32, #tpu.memory_space<vmem>>, %arg4: memref<1x128xf32, #tpu.memory_space<vmem>>, %arg5: memref<1x128xf32, #tpu.memory_space<vmem>>, %arg6: memref<128x128xbf16, #tpu.memory_space<vmem>>, %arg7: memref<1x128xf32, #tpu.memory_space<vmem>>, %arg8: memref<1x128xf32, #tpu.memory_space<vmem>>, %arg9: memref<1x128xf32, #tpu.memory_space<vmem>>, %arg10: memref<128x128xbf16, #tpu.memory_space<vmem>>) attributes {dimension_semantics = [#tpu.dimension_semantics<parallel>], iteration_bounds = array<i64: 2>, scalar_prefetch = 0 : i64, scratch_operands = 0 : i64, tpu.core_type = #tpu.core_type<tc>, window_params = [{transform_indices = @transform_0, window_bounds = array<i64: 128, 128>}, {pipeline_mode = #tpu.pipeline_mode<synchronous>, transform_indices = @transform_1, window_bounds = array<i64: 128, 128>}, {pipeline_mode = #tpu.pipeline_mode<synchronous>, transform_indices = @transform_2, window_bounds = array<i64: 1, 128>}, {pipeline_mode = #tpu.pipeline_mode<synchronous>, transform_indices = @transform_3, window_bounds = array<i64: 1, 128>}, {pipeline_mode = #tpu.pipeline_mode<synchronous>, transform_indices = @transform_4, window_bounds = array<i64: 1, 128>}, {pipeline_mode = #tpu.pipeline_mode<synchronous>, transform_indices = @transform_5, window_bounds = array<i64: 128, 128>}, {pipeline_mode = #tpu.pipeline_mode<synchronous>, transform_indices = @transform_6, window_bounds = array<i64: 1, 128>}, {pipeline_mode = #tpu.pipeline_mode<synchronous>, transform_indices = @transform_7, window_bounds = array<i64: 1, 128>}, {pipeline_mode = #tpu.pipeline_mode<synchronous>, transform_indices = @transform_8, window_bounds = array<i64: 1, 128>}, {transform_indices = @transform_9, window_bounds = array<i64: 128, 128>}]} {
    %c0 = arith.constant 0 : index
    %c0_0 = arith.constant 0 : index
    %0 = vector.load %arg1[%c0, %c0_0] : memref<128x128xbf16, #tpu.memory_space<vmem>>, vector<128x128xbf16>
    %c0_1 = arith.constant 0 : index
    %c0_2 = arith.constant 0 : index
    %1 = vector.load %arg2[%c0_1, %c0_2] : memref<128x128xbf16, #tpu.memory_space<vmem>>, vector<128x128xbf16>
    %cst = arith.constant dense<0.000000e+00> : vector<128x128xf32>
    %2 = tpu.matmul %0, %1, %cst {dimension_numbers = #tpu.dot_dimension_numbers<[1], [0], [0], [1], [0, 0, 1, 1], [], []>} : vector<128x128xbf16>, vector<128x128xbf16>, vector<128x128xf32> -> vector<128x128xf32>
    %c0_3 = arith.constant 0 : index
    %c0_4 = arith.constant 0 : index
    %3 = vector.load %arg3[%c0_3, %c0_4] : memref<1x128xf32, #tpu.memory_space<vmem>>, vector<1x128xf32>
    %4 = vector.broadcast %3 : vector<1x128xf32> to vector<128x128xf32>
    %5 = arith.addf %2, %4 : vector<128x128xf32>
    %c0_5 = arith.constant 0 : index
    %c0_6 = arith.constant 0 : index
    %6 = vector.load %arg4[%c0_5, %c0_6] : memref<1x128xf32, #tpu.memory_space<vmem>>, vector<1x128xf32>
    %c0_7 = arith.constant 0 : index
    %c0_8 = arith.constant 0 : index
    %7 = vector.load %arg5[%c0_7, %c0_8] : memref<1x128xf32, #tpu.memory_space<vmem>>, vector<1x128xf32>
    %cst_9 = arith.constant dense<0.000000e+00> : vector<128xf32>
    %8 = vector.multi_reduction <add>, %5, %cst_9 [1] : vector<128x128xf32> to vector<128xf32>
    %9 = vector.shape_cast %8 : vector<128xf32> to vector<128x1xf32>
    %10 = arith.mulf %5, %5 : vector<128x128xf32>
    %cst_10 = arith.constant dense<0.000000e+00> : vector<128xf32>
    %11 = vector.multi_reduction <add>, %10, %cst_10 [1] : vector<128x128xf32> to vector<128xf32>
    %12 = vector.shape_cast %11 : vector<128xf32> to vector<128x1xf32>
    %cst_11 = arith.constant 7.812500e-03 : f32
    %13 = vector.broadcast %cst_11 : f32 to vector<128x1xf32>
    %14 = arith.mulf %9, %13 : vector<128x1xf32>
    %cst_12 = arith.constant 7.812500e-03 : f32
    %15 = vector.broadcast %cst_12 : f32 to vector<128x1xf32>
    %16 = arith.mulf %12, %15 : vector<128x1xf32>
    %17 = arith.mulf %14, %14 : vector<128x1xf32>
    %18 = arith.subf %16, %17 : vector<128x1xf32>
    %cst_13 = arith.constant 0.000000e+00 : f32
    %19 = vector.broadcast %cst_13 : f32 to vector<128x1xf32>
    %20 = arith.maximumf %18, %19 : vector<128x1xf32>
    %21 = vector.broadcast %14 : vector<128x1xf32> to vector<128x128xf32>
    %22 = arith.subf %5, %21 : vector<128x128xf32>
    %cst_14 = arith.constant 9.99999974E-6 : f32
    %23 = vector.broadcast %cst_14 : f32 to vector<128x1xf32>
    %24 = arith.addf %20, %23 : vector<128x1xf32>
    %25 = math.rsqrt %24 : vector<128x1xf32>
    %26 = vector.broadcast %25 : vector<128x1xf32> to vector<128x128xf32>
    %27 = arith.mulf %22, %26 : vector<128x128xf32>
    %28 = vector.broadcast %6 : vector<1x128xf32> to vector<128x128xf32>
    %29 = arith.mulf %27, %28 : vector<128x128xf32>
    %30 = vector.broadcast %7 : vector<1x128xf32> to vector<128x128xf32>
    %31 = arith.addf %29, %30 : vector<128x128xf32>
    %cst_15 = arith.constant 0.000000e+00 : f32
    %32 = vector.broadcast %cst_15 : f32 to vector<128x128xf32>
    %33 = arith.maximumf %31, %32 : vector<128x128xf32>
    %34 = arith.truncf %33 : vector<128x128xf32> to vector<128x128xbf16>
    %c0_16 = arith.constant 0 : index
    %c0_17 = arith.constant 0 : index
    %35 = vector.load %arg6[%c0_16, %c0_17] : memref<128x128xbf16, #tpu.memory_space<vmem>>, vector<128x128xbf16>
    %cst_18 = arith.constant dense<0.000000e+00> : vector<128x128xf32>
    %36 = tpu.matmul %34, %35, %cst_18 {dimension_numbers = #tpu.dot_dimension_numbers<[1], [0], [0], [1], [0, 0, 1, 1], [], []>} : vector<128x128xbf16>, vector<128x128xbf16>, vector<128x128xf32> -> vector<128x128xf32>
    %c0_19 = arith.constant 0 : index
    %c0_20 = arith.constant 0 : index
    %37 = vector.load %arg7[%c0_19, %c0_20] : memref<1x128xf32, #tpu.memory_space<vmem>>, vector<1x128xf32>
    %38 = vector.broadcast %37 : vector<1x128xf32> to vector<128x128xf32>
    %39 = arith.addf %36, %38 : vector<128x128xf32>
    %c0_21 = arith.constant 0 : index
    %c0_22 = arith.constant 0 : index
    %40 = vector.load %arg8[%c0_21, %c0_22] : memref<1x128xf32, #tpu.memory_space<vmem>>, vector<1x128xf32>
    %c0_23 = arith.constant 0 : index
    %c0_24 = arith.constant 0 : index
    %41 = vector.load %arg9[%c0_23, %c0_24] : memref<1x128xf32, #tpu.memory_space<vmem>>, vector<1x128xf32>
    %cst_25 = arith.constant dense<0.000000e+00> : vector<128xf32>
    %42 = vector.multi_reduction <add>, %39, %cst_25 [1] : vector<128x128xf32> to vector<128xf32>
    %43 = vector.shape_cast %42 : vector<128xf32> to vector<128x1xf32>
    %44 = arith.mulf %39, %39 : vector<128x128xf32>
    %cst_26 = arith.constant dense<0.000000e+00> : vector<128xf32>
    %45 = vector.multi_reduction <add>, %44, %cst_26 [1] : vector<128x128xf32> to vector<128xf32>
    %46 = vector.shape_cast %45 : vector<128xf32> to vector<128x1xf32>
    %cst_27 = arith.constant 7.812500e-03 : f32
    %47 = vector.broadcast %cst_27 : f32 to vector<128x1xf32>
    %48 = arith.mulf %43, %47 : vector<128x1xf32>
    %cst_28 = arith.constant 7.812500e-03 : f32
    %49 = vector.broadcast %cst_28 : f32 to vector<128x1xf32>
    %50 = arith.mulf %46, %49 : vector<128x1xf32>
    %51 = arith.mulf %48, %48 : vector<128x1xf32>
    %52 = arith.subf %50, %51 : vector<128x1xf32>
    %cst_29 = arith.constant 0.000000e+00 : f32
    %53 = vector.broadcast %cst_29 : f32 to vector<128x1xf32>
    %54 = arith.maximumf %52, %53 : vector<128x1xf32>
    %55 = vector.broadcast %48 : vector<128x1xf32> to vector<128x128xf32>
    %56 = arith.subf %39, %55 : vector<128x128xf32>
    %cst_30 = arith.constant 9.99999974E-6 : f32
    %57 = vector.broadcast %cst_30 : f32 to vector<128x1xf32>
    %58 = arith.addf %54, %57 : vector<128x1xf32>
    %59 = math.rsqrt %58 : vector<128x1xf32>
    %60 = vector.broadcast %59 : vector<128x1xf32> to vector<128x128xf32>
    %61 = arith.mulf %56, %60 : vector<128x128xf32>
    %62 = vector.broadcast %40 : vector<1x128xf32> to vector<128x128xf32>
    %63 = arith.mulf %61, %62 : vector<128x128xf32>
    %64 = vector.broadcast %41 : vector<1x128xf32> to vector<128x128xf32>
    %65 = arith.addf %63, %64 : vector<128x128xf32>
    %c0_31 = arith.constant 0 : index
    %c0_32 = arith.constant 0 : index
    %66 = vector.load %arg1[%c0_31, %c0_32] : memref<128x128xbf16, #tpu.memory_space<vmem>>, vector<128x128xbf16>
    %67 = arith.extf %66 : vector<128x128xbf16> to vector<128x128xf32>
    %68 = arith.addf %65, %67 : vector<128x128xf32>
    %cst_33 = arith.constant 0.000000e+00 : f32
    %69 = vector.broadcast %cst_33 : f32 to vector<128x128xf32>
    %70 = arith.maximumf %68, %69 : vector<128x128xf32>
    %71 = arith.truncf %70 : vector<128x128xf32> to vector<128x128xbf16>
    %c0_34 = arith.constant 0 : index
    %c0_35 = arith.constant 0 : index
    %72 = vector.load %arg10[%c0_34, %c0_35] : memref<128x128xbf16, #tpu.memory_space<vmem>>, vector<128x128xbf16>
    tpu.vector_store %arg10[%c0_34, %c0_35], %71 {strides = array<i32>} : memref<128x128xbf16, #tpu.memory_space<vmem>>, vector<128x128xbf16>,
    return
  }
  func.func @transform_0(%arg0: i32) -> (i32, i32) {
    %c0_i32 = arith.constant 0 : i32
    %c0_i32_0 = arith.constant 0 : i32
    return %arg0, %c0_i32 : i32, i32
  }
  func.func @transform_1(%arg0: i32) -> (i32, i32) {
    %c0_i32 = arith.constant 0 : i32
    %c0_i32_0 = arith.constant 0 : i32
    %c0_i32_1 = arith.constant 0 : i32
    return %c0_i32, %c0_i32_0 : i32, i32
  }
  func.func @transform_2(%arg0: i32) -> (i32, i32) {
    %c0_i32 = arith.constant 0 : i32
    %c0_i32_0 = arith.constant 0 : i32
    %c0_i32_1 = arith.constant 0 : i32
    return %c0_i32, %c0_i32_0 : i32, i32
  }
  func.func @transform_3(%arg0: i32) -> (i32, i32) {
    %c0_i32 = arith.constant 0 : i32
    %c0_i32_0 = arith.constant 0 : i32
    %c0_i32_1 = arith.constant 0 : i32
    return %c0_i32, %c0_i32_0 : i32, i32
  }
  func.func @transform_4(%arg0: i32) -> (i32, i32) {
    %c0_i32 = arith.constant 0 : i32
    %c0_i32_0 = arith.constant 0 : i32
    %c0_i32_1 = arith.constant 0 : i32
    return %c0_i32, %c0_i32_0 : i32, i32
  }
  func.func @transform_5(%arg0: i32) -> (i32, i32) {
    %c0_i32 = arith.constant 0 : i32
    %c0_i32_0 = arith.constant 0 : i32
    %c0_i32_1 = arith.constant 0 : i32
    return %c0_i32, %c0_i32_0 : i32, i32
  }
  func.func @transform_6(%arg0: i32) -> (i32, i32) {
    %c0_i32 = arith.constant 0 : i32
    %c0_i32_0 = arith.constant 0 : i32
    %c0_i32_1 = arith.constant 0 : i32
    return %c0_i32, %c0_i32_0 : i32, i32
  }
  func.func @transform_7(%arg0: i32) -> (i32, i32) {
    %c0_i32 = arith.constant 0 : i32
    %c0_i32_0 = arith.constant 0 : i32
    %c0_i32_1 = arith.constant 0 : i32
    return %c0_i32, %c0_i32_0 : i32, i32
  }
  func.func @transform_8(%arg0: i32) -> (i32, i32) {
    %c0_i32 = arith.constant 0 : i32
    %c0_i32_0 = arith.constant 0 : i32
    %c0_i32_1 = arith.constant 0 : i32
    return %c0_i32, %c0_i32_0 : i32, i32
  }
  func.func @transform_9(%arg0: i32) -> (i32, i32) {
    %c0_i32 = arith.constant 0 : i32
    %c0_i32_0 = arith.constant 0 : i32
    return %arg0, %c0_i32 : i32, i32
  }
}

</mosaic_0001>

<bundles_post_ra>
// kernel: residual_block.1
= control target key start
LH: loop header
LB: loop body
LE: loop exit
PB: predicated region body
PF: predicated region fallthrough
CT: control target
= control target key end

     0   :  { %14 = vsyncpa [#allocation3], 0  ;;  %s2633_s0 = inlined_call_operand.vmem [shape: bf16[256,128], index: 0, kind: input, shape index: {}]   ;;  %s2634_s1 = inlined_call_operand.vmem [shape: bf16[128,128], index: 1, kind: input, shape index: {}]   ;;  %s2635_s2 = inlined_call_operand.vmem [shape: f32[1,128], index: 2, kind: input, shape index: {}]   ;;  %s2636_s3 = inlined_call_operand.vmem [shape: f32[1,128], index: 3, kind: input, shape index: {}]   ;;  %s2637_s4 = inlined_call_operand.vmem [shape: f32[1,128], index: 4, kind: input, shape index: {}]   ;;  %s2638_s5 = inlined_call_operand.vmem [shape: bf16[128,128], index: 5, kind: input, shape index: {}]   ;;  %s2639_s6 = inlined_call_operand.vmem [shape: f32[1,128], index: 6, kind: input, shape index: {}]   ;;  %s2640_s7 = inlined_call_operand.vmem [shape: f32[1,128], index: 7, kind: input, shape index: {}]   ;;  %s2641_s8 = inlined_call_operand.vmem [shape: f32[1,128], index: 8, kind: input, shape index: {}]   ;;  %s2642_s9 = inlined_call_operand.hbm [shape: bf16[256,128], index: 9, kind: output, shape index: {}]  }
   0x1   :  { %16 = vsyncpa [#allocation3 + $0x1], 0  ;;  %s1983_s30 = smov 0   ;;  %s1985_s10 = smov 0  }
   0x2   :  { %s1987_s11 = smov 0   ;;  %s1989_s12 = smov 0  }
   0x3 LB: > { %s2004_s13 = sadd.s32 4294967295, %s1928_s12   ;;  %s1503_s14 = sadd.s32 4294967294, %s1928_s12   ;;  %s1928_s12 = sphi %s1989_s12, %s2648_s12   ;;  %s1924_s11 = sphi %s1987_s11, %s2647_s11   ;;  %s1920_s10 = sphi %s1985_s10, %s2646_s10   ;;  %s1916_s30 = sphi %s1983_s30, %s2645_s30  }
   0x4   : > { %s2008_s15 = sadd.s32 1, %s1928_s12   ;;  %s223_s16 = sadd.s32 1, %s1924_s11 }
   0x5   : > { %s220_s17 = ssub.s32 %s1928_s12, %s2008_s15  ;;  %p233_p0 = scmp.ne.s32.totalorder %s1924_s11, %s1920_s10 }
   0x6   : > { %p221_p1 = scmp.eq.s32.totalorder %s220_s17, 0  ;;  %p234_p2 = scmp.eq.s32.totalorder %s2004_s13, 1 }
   0x7   : > { %p239_p3 = scmp.ne.s32.totalorder %s1920_s10, %s1916_s30  ;;  %p240_p4 = scmp.eq.s32.totalorder %s1503_s14, 1 }
   0x8   : > { %s2019_s18 = scalar_select %p221_p1, %s1924_s11, %s223_s16  }
   0x9   : > { %p2021_p5 = por %p234_p2, %p233_p0  ;;  %p2025_p6 = por %p240_p4, %p239_p3 }
   0xa   : > { %p1506_p7 = scmp.ge.s32.totalorder %s1928_s12, 1  ;;  %p291_p8 = scmp.lt.s32.totalorder %s1928_s12, 3 }
   0xc   : > { %p292_p9 = pnand %p1506_p7, %p291_p8 }
   0xd   : > { %v1762_v0 = vld [vmem:[%s2634_s1] sm:$0xff] (!%p292_p9)   ;;  %s1508_s23 = sshll.u32 (!%p292_p9), %s2004_s13, 4  ;;  %v1763_v1 = vld [vmem:[%s2634_s1 + $0x8] sm:$0xff] (!%p292_p9)   ;;  %v1764_v2 = vld [vmem:[%s2634_s1 + $0x10] sm:$0xff] (!%p292_p9)   ;;  %s324_s25 = sand.u32 (!%p292_p9), 1, %s1920_s10  }
   0xe   : > { %295 = sbr.rel (%p292_p9) target bundleno = 909 (0x38d), region = 56  ;;  %p328_p10 = scmp.lt.s32.totalorder (!%p292_p9), %s1508_s23, 31  ;;  %1657 = vmatprep.subr.bf16.mxu0 (!%p292_p9), %v1762_v0  ;;  %v1765_v3 = vld [vmem:[%s2634_s1 + $0x18] sm:$0xff] (!%p292_p9)   ;;  %v1766_v5 = vld [vmem:[%s2634_s1 + $0x20] sm:$0xff] (!%p292_p9)   ;;  %v1767_v6 = vld [vmem:[%s2634_s1 + $0x28] sm:$0xff] (!%p292_p9)  }
   0xf   : > { %1658 = vmatpush3.bf16.msra.mxu0 (!%p292_p9), %v1762_v0  ;;  %v1768_v7 = vld [vmem:[%s2634_s1 + $0x30] sm:$0xff] (!%p292_p9)   ;;  %v1769_v8 = vld [vmem:[%s2634_s1 + $0x38] sm:$0xff] (!%p292_p9)   ;;  %v2072_v16 = vld [vmem:[%s2635_s2] ss:$0 sm:$0xff] (!%p292_p9)  ;;  %s1507_s26 = sshll.u32 (!%p292_p9), %s324_s25, 6  ;;  %s2592_s21 = scalar_lea.sflag (!%p292_p9), [#allocation3], %s324_s25 }
  0x10   : > { %1659 = vmatprep.subr.bf16.mxu0 (!%p292_p9), %v1763_v1  ;;  %v1778_v46 = vld [vmem:[%s2638_s5] sm:$0xff] (!%p292_p9)   ;;  %v1779_v50 = vld [vmem:[%s2638_s5 + $0x8] sm:$0xff] (!%p292_p9)   ;;  %v1780_v53 = vld [vmem:[%s2638_s5 + $0x10] sm:$0xff] (!%p292_p9)   ;;  %s2494_s27 = scalar_lea.vmem (!%p292_p9), [#allocation2], %s1507_s26  ;;  %s1930_s22 = smov (!%p292_p9), [#allocation2]  }
  0x11   : > { %1689 = vmatprep.subr.bf16.mxu1 (!%p292_p9), %v1778_v46  ;;  %v1781_v56 = vld [vmem:[%s2638_s5 + $0x18] sm:$0xff] (!%p292_p9)   ;;  %v1782_v59 = vld [vmem:[%s2638_s5 + $0x20] sm:$0xff] (!%p292_p9)   ;;  %v1783_v62 = vld [vmem:[%s2638_s5 + $0x28] sm:$0xff] (!%p292_p9)   ;;  %s1870_s24 = sshll.u32 (!%p292_p9), %s1930_s22, 4  ;;  %s1871_s24 = int_to_ptr.vmem [resolvable:$false] %s1870_s24 }
  0x12   : > { %1690 = vmatpush3.bf16.msra.mxu1 (!%p292_p9), %v1778_v46 }
  0x13   : > { %1660 = vmatpush3.bf16.msra.mxu0 (!%p292_p9), %v1763_v1  ;;  %1691 = vmatprep.subr.bf16.mxu1 (!%p292_p9), %v1779_v50  ;;  %v1784_v1 = vld [vmem:[%s2638_s5 + $0x30] sm:$0xff] (!%p292_p9)  }
  0x14   : > { %1661 = vmatprep.subr.bf16.mxu0 (!%p292_p9), %v1764_v2 }
  0x15   : > { %s2650_s23 = smov (!%p328_p10, %s1508_s23), 31 }
  0x16   : > { %s1509_s28 = sshll.u32 %s2650_s23, 2  ;;  %1692 = vmatpush3.bf16.msra.mxu1 %v1779_v50  ;;  %s1872_s23 = scalar_lea.vmem %s1871_s24, 2048 }
  0x17   : > { %s2044_s16 = scalar_lea.vmem %s2633_s0, %s1509_s28  ;;  %1662 = vmatpush3.bf16.msra.mxu0 %v1764_v2  ;;  %1693 = vmatprep.subr.bf16.mxu1 %v1780_v53  ;;  %s1577_s28 = sshll.u32 %s2004_s13, 10 }
  0x18   : > { %v335_v4 = vld [vmem:[%s2044_s16] sm:$0xff]   ;;  %1663 = vmatprep.subr.bf16.mxu0 %v1765_v3  ;;  %v337_v9 = vld [vmem:[%s2044_s16 + $0x8] sm:$0xff]   ;;  %v339_v10 = vld [vmem:[%s2044_s16 + $0x10] sm:$0xff]   ;;  %s2585_s17 = scalar_lea.hbm %s2642_s9, %s1577_s28 }
  0x19   : > { %1673 = vmatprep.mubr.bf16.mxu0 %v335_v4  ;;  %v341_v11 = vld [vmem:[%s2044_s16 + $0x18] sm:$0xff]   ;;  %v343_v12 = vld [vmem:[%s2044_s16 + $0x20] sm:$0xff]   ;;  %v345_v13 = vld [vmem:[%s2044_s16 + $0x28] sm:$0xff]  }
  0x1a   : > { %v347_v14 = vld [vmem:[%s2044_s16 + $0x30] sm:$0xff]   ;;  %v349_v15 = vld [vmem:[%s2044_s16 + $0x38] sm:$0xff]   ;;  %1694 = vmatpush3.bf16.msra.mxu1 %v1780_v53 }
  0x1b   : > { %1664 = vmatpush3.bf16.msra.mxu0 %v1765_v3  ;;  %1695 = vmatprep.subr.bf16.mxu1 %v1781_v56  ;;  %v1785_v4 = vld [vmem:[%s2638_s5 + $0x38] sm:$0xff]  }
  0x1c   : > { %1665 = vmatprep.subr.bf16.mxu0 %v1766_v5 }
  0x1e   : > { %1696 = vmatpush3.bf16.msra.mxu1 %v1781_v56 }
  0x1f   : > { %1666 = vmatpush3.bf16.msra.mxu0 %v1766_v5  ;;  %1697 = vmatprep.subr.bf16.mxu1 %v1782_v59 }
  0x20   : > { %1667 = vmatprep.subr.bf16.mxu0 %v1767_v6 }
  0x22   : > { %1698 = vmatpush3.bf16.msra.mxu1 %v1782_v59 }
  0x23   : > { %1668 = vmatpush3.bf16.msra.mxu0 %v1767_v6  ;;  %1699 = vmatprep.subr.bf16.mxu1 %v1783_v62 }
  0x24   : > { %1669 = vmatprep.subr.bf16.mxu0 %v1768_v7 }
  0x26   : > { %1700 = vmatpush3.bf16.msra.mxu1 %v1783_v62 }
  0x27   : > { %1670 = vmatpush3.bf16.msra.mxu0 %v1768_v7  ;;  %1701 = vmatprep.subr.bf16.mxu1 %v1784_v1 }
  0x28   : > { %1671 = vmatprep.subr.bf16.mxu0 %v1769_v8 }
  0x2a   : > { %1702 = vmatpush3.bf16.msra.mxu1 %v1784_v1 }
  0x2b   : > { %1672 = vmatpush3.bf16.msra.mxu0 %v1769_v8  ;;  %1703 = vmatprep.subr.bf16.mxu1 %v1785_v4 }
  0x2e   : > { %1674 = vmatmul.mubr.bf16.vlgmr.msra.gmra.mrb[0].mxu0 %v337_v9  ;;  %1704 = vmatpush3.bf16.msra.mxu1 %v1785_v4 }
  0x2f   : > { %1677 = vmatprep.mubr.bf16.mxu0 %v339_v10 }
  0x36   : > { %1678 = vmatmul.mubr.bf16.gmra.mrb[4].mxu0 %v341_v11 }
  0x37   : > { %1681 = vmatprep.mubr.bf16.mxu0 %v343_v12 }
  0x3e   : > { %1682 = vmatmul.mubr.bf16.gmra.mrb[8].mxu0 %v345_v13 }
  0x3f   : > { %1685 = vmatprep.mubr.bf16.mxu0 %v347_v14 }
  0x46   : > { %1686 = vmatmul.mubr.bf16.gmra.mrb[12].mxu0 %v349_v15 }
 0x101   : > { %v1675_v17 = vpop.f32.mrb[0].mxu0 }
 0x102   : > { %v2075_v18 = vadd.f32 %v1675_v17, %v2072_v16  ;;  %v504_v19 = vpop.f32.mrb[1].mxu0 }
 0x103   : > { %v2078_v20 = vadd.f32 %v2072_v16, %v504_v19  ;;  %v1676_v21 = vpop.f32.mrb[2].mxu0 }
 0x104   : > { %573 = vadd.xlane.f32.xlu1 %v2075_v18  ;;  %v507_v22 = vpop.f32.mrb[3].mxu0  ;;  %v2083_v23 = vadd.f32 %v1676_v21, %v2072_v16  ;;  %v603_v24 = vmul.f32 %v2075_v18, %v2075_v18 }
 0x105   : > { %569 = vadd.xlane.f32.xlu0 %v2078_v20  ;;  %v2089_v26 = vadd.f32 %v2072_v16, %v507_v22  ;;  %v601_v32 = vmul.f32 %v2078_v20, %v2078_v20 }
 0x106   : > { %v604_v27 = vmul.f32 %v2083_v23, %v2083_v23 }
 0x107   : > { %v602_v31 = vmul.f32 %v2089_v26, %v2089_v26 }
 0x108   : > { %575 = vadd.xlane.f32.xlu1 %v2083_v23 }
 0x109   : > { %621 = vadd.xlane.f32.xlu0 %v603_v24  ;;  %v1679_v25 = vpop.f32.mrb[4].mxu0 }
 0x10a   : > { %v520_v28 = vpop.f32.mrb[5].mxu0  ;;  %v2102_v36 = vadd.f32 %v1679_v25, %v2072_v16 }
 0x10b   : > { %v1680_v29 = vpop.f32.mrb[6].mxu0  ;;  %v2110_v40 = vadd.f32 %v2072_v16, %v520_v28 }
 0x10c   : > { %623 = vadd.xlane.f32.xlu1 %v604_v27  ;;  %v523_v30 = vpop.f32.mrb[7].mxu0  ;;  %v2099_v33 = vadd.f32 %v1680_v29, %v2072_v16  ;;  %v607_v44 = vmul.f32 %v2102_v36, %v2102_v36 }
 0x10d   : > { %571 = vadd.xlane.f32.xlu0 %v2089_v26  ;;  %v2107_v39 = vadd.f32 %v2072_v16, %v523_v30  ;;  %v605_v49 = vmul.f32 %v2110_v40, %v2110_v40 }
 0x10e   : > { %v608_v42 = vmul.f32 %v2099_v33, %v2099_v33 }
 0x10f   : > { %v606_v48 = vmul.f32 %v2107_v39, %v2107_v39 }
 0x110   : > { %619 = vadd.xlane.f32.xlu1 %v602_v31 }
 0x111   : > { %617 = vadd.xlane.f32.xlu0 %v601_v32  ;;  %v1683_v34 = vpop.f32.mrb[8].mxu0 }
 0x112   : > { %v536_v35 = vpop.f32.mrb[9].mxu0  ;;  %v2132_v52 = vadd.f32 %v1683_v34, %v2072_v16 }
 0x113   : > { %v1684_v37 = vpop.f32.mrb[10].mxu0  ;;  %v2143_v55 = vadd.f32 %v2072_v16, %v536_v35 }
 0x114   : > { %583 = vadd.xlane.f32.xlu1 %v2099_v33  ;;  %v539_v38 = vpop.f32.mrb[11].mxu0  ;;  %v2129_v51 = vadd.f32 %v1684_v37, %v2072_v16  ;;  %v611_v58 = vmul.f32 %v2132_v52, %v2132_v52 }
 0x115   : > { %581 = vadd.xlane.f32.xlu0 %v2102_v36  ;;  %v2140_v54 = vadd.f32 %v2072_v16, %v539_v38  ;;  %v609_v61 = vmul.f32 %v2143_v55, %v2143_v55 }
 0x116   : > { %v612_v57 = vmul.f32 %v2129_v51, %v2129_v51 }
 0x117   : > { %v610_v60 = vmul.f32 %v2140_v54, %v2140_v54 }
 0x118   : > { %579 = vadd.xlane.f32.xlu1 %v2107_v39 }
 0x119   : > { %577 = vadd.xlane.f32.xlu0 %v2110_v40  ;;  %v1687_v41 = vpop.f32.mrb[12].mxu0 }
 0x11a   : > { %v552_v43 = vpop.f32.mrb[13].mxu0  ;;  %v2168_v0 = vadd.f32 %v1687_v41, %v2072_v16 }
 0x11b   : > { %v1688_v45 = vpop.f32.mrb[14].mxu0  ;;  %v2179_v3 = vadd.f32 %v2072_v16, %v552_v43 }
 0x11c   : > { %631 = vadd.xlane.f32.xlu1 %v608_v42  ;;  %v555_v47 = vpop.f32.mrb[15].mxu0  ;;  %v2165_v63 = vadd.f32 %v1688_v45, %v2072_v16  ;;  %v615_v8 = vmul.f32 %v2168_v0, %v2168_v0 }
 0x11d   : > { %629 = vadd.xlane.f32.xlu0 %v607_v44  ;;  %v2176_v2 = vadd.f32 %v2072_v16, %v555_v47  ;;  %v613_v6 = vmul.f32 %v2179_v3, %v2179_v3 }
 0x11e   : > { %v616_v7 = vmul.f32 %v2165_v63, %v2165_v63 }
 0x11f   : > { %v614_v5 = vmul.f32 %v2176_v2, %v2176_v2 }
 0x120   : > { %627 = vadd.xlane.f32.xlu1 %v606_v48 }
 0x121   : > { %625 = vadd.xlane.f32.xlu0 %v605_v49 }
 0x124   : > { %591 = vadd.xlane.f32.xlu1 %v2129_v51 }
 0x125   : > { %589 = vadd.xlane.f32.xlu0 %v2132_v52 }
 0x128   : > { %587 = vadd.xlane.f32.xlu1 %v2140_v54 }
 0x129   : > { %585 = vadd.xlane.f32.xlu0 %v2143_v55 }
 0x12c   : > { %639 = vadd.xlane.f32.xlu1 %v612_v57 }
 0x12d   : > { %637 = vadd.xlane.f32.xlu0 %v611_v58 }
 0x130   : > { %635 = vadd.xlane.f32.xlu1 %v610_v60 }
 0x131   : > { %633 = vadd.xlane.f32.xlu0 %v609_v61 }
 0x134   : > { %599 = vadd.xlane.f32.xlu1 %v2165_v63 }
 0x135   : > { %597 = vadd.xlane.f32.xlu0 %v2168_v0 }
 0x138   : > { %595 = vadd.xlane.f32.xlu1 %v2176_v2 }
 0x139   : > { %593 = vadd.xlane.f32.xlu0 %v2179_v3 }
 0x13c   : > { %643 = vadd.xlane.f32.xlu1 %v614_v5 }
 0x13d   : > { %641 = vadd.xlane.f32.xlu0 %v613_v6 }
 0x140   : > { %647 = vadd.xlane.f32.xlu1 %v616_v7 }
 0x141   : > { %645 = vadd.xlane.f32.xlu0 %v615_v8 }
 0x191   : > { %v574_v9 = vpop.xlane.xlu1 %573 }
 0x192   : > { %v570_v10 = vpop.xlane.xlu0 %569  ;;  %v651_v11 = vmul.f32 0.0078125, %v574_v9 }
 0x193   : > { %v2194_v25 = vmul.f32 0.0078125, %v570_v10 }
 0x194   : > { %v683_v15 = vmul.f32 %v651_v11, %v651_v11  ;;  %v731_v61 = vsub.f32 %v2075_v18, %v651_v11 }
 0x195   : > { %v576_v12 = vpop.xlane.xlu1 %575  ;;  %v681_v38 = vmul.f32 %v2194_v25, %v2194_v25 }
 0x196   : > { %v652_v13 = vmul.f32 0.0078125, %v576_v12  ;;  %v622_v14 = vpop.xlane.xlu0 %621 }
 0x197   : > { %v667_v16 = vmul.f32 0.0078125, %v622_v14 }
 0x198   : > { %v684_v21 = vmul.f32 %v652_v13, %v652_v13  ;;  %v732_v6 = vsub.f32 %v2083_v23, %v652_v13 }
 0x199   : > { %v699_v17 = vsub.f32 %v667_v16, %v683_v15  ;;  %v624_v19 = vpop.xlane.xlu1 %623 }
 0x19a   : > { %v668_v22 = vmul.f32 0.0078125, %v624_v19  ;;  %v572_v24 = vpop.xlane.xlu0 %571 }
 0x19b   : > { %v715_v27 = vmax.f32 %v699_v17, 0.0  ;;  %v2196_v28 = vmul.f32 0.0078125, %v572_v24 }
 0x19c   : > { %v700_v29 = vsub.f32 %v668_v22, %v684_v21  ;;  %v2223_v21 = vld [vmem:[%s2636_s3] ss:$0 sm:$0xff] }
 0x19d   : > { %v747_v30 = vadd.f32 1e-05, %v715_v27  ;;  %v682_v31 = vmul.f32 %v2196_v28, %v2196_v28  ;;  %v620_v32 = vpop.xlane.xlu1 %619  ;;  %v730_v16 = vsub.f32 %v2089_v26, %v2196_v28  ;;  %v729_v26 = vsub.f32 %v2078_v20, %v2194_v25 }
 0x19e   : > { %v716_v34 = vmax.f32 %v700_v29, 0.0  ;;  %v666_v35 = vmul.f32 0.0078125, %v620_v32  ;;  %v618_v37 = vpop.xlane.xlu0 %617 }
 0x19f   : > { %v665_v41 = vmul.f32 0.0078125, %v618_v37  ;;  %1794 = vrsqrt.f32 %v747_v30 }
 0x1a0   : > { %v748_v42 = vadd.f32 1e-05, %v716_v34  ;;  %v698_v43 = vsub.f32 %v666_v35, %v682_v31 }
 0x1a1   : > { %v697_v44 = vsub.f32 %v665_v41, %v681_v38  ;;  %v584_v45 = vpop.xlane.xlu1 %583 }
 0x1a2   : > { %1796 = vrsqrt.f32 %v748_v42  ;;  %v714_v46 = vmax.f32 %v698_v43, 0.0  ;;  %v582_v47 = vpop.xlane.xlu0 %581  ;;  %v2202_v56 = vmul.f32 0.0078125, %v584_v45 }
 0x1a3   : > { %v713_v48 = vmax.f32 %v697_v44, 0.0  ;;  %v2204_v58 = vmul.f32 0.0078125, %v582_v47  ;;  %v2234_v44 = vld [vmem:[%s2637_s4] ss:$0 sm:$0xff] }
 0x1a4   : > { %v746_v49 = vadd.f32 1e-05, %v714_v46  ;;  %v688_v62 = vmul.f32 %v2202_v56, %v2202_v56 }
 0x1a5   : > { %v745_v50 = vadd.f32 1e-05, %v713_v48  ;;  %v580_v53 = vpop.xlane.xlu1 %579  ;;  %v687_v7 = vmul.f32 %v2204_v58, %v2204_v58 }
 0x1a6   : > { %1798 = vrsqrt.f32 %v746_v49  ;;  %v578_v57 = vpop.xlane.xlu0 %577  ;;  %v2209_v1 = vmul.f32 0.0078125, %v580_v53 }
 0x1a7   : > { %1800 = vrsqrt.f32 %v745_v50  ;;  %v2214_v8 = vmul.f32 0.0078125, %v578_v57 }
 0x1a8   : > { %v686_v17 = vmul.f32 %v2209_v1, %v2209_v1 }
 0x1a9   : > { %v632_v59 = vpop.xlane.xlu1 %631  ;;  %v1795_v60 = vpop.eup %1794  ;;  %v685_v22 = vmul.f32 %v2214_v8, %v2214_v8 }
 0x1aa   : > { %v672_v4 = vmul.f32 0.0078125, %v632_v59  ;;  %v630_v5 = vpop.xlane.xlu0 %629  ;;  %v779_v18 = vmul.f32 %v1795_v60, %v731_v61 }
 0x1ab   : > { %v671_v9 = vmul.f32 0.0078125, %v630_v5 }
 0x1ac   : > { %v1797_v10 = vpop.eup %1796  ;;  %v704_v12 = vsub.f32 %v672_v4, %v688_v62  ;;  %v801_v41 = vmul.f32 %v2223_v21, %v779_v18 }
 0x1ad   : > { %v703_v14 = vsub.f32 %v671_v9, %v687_v7  ;;  %v628_v15 = vpop.xlane.xlu1 %627  ;;  %v780_v11 = vmul.f32 %v1797_v10, %v732_v6  ;;  %v736_v7 = vsub.f32 %v2099_v33, %v2202_v56  ;;  %v735_v33 = vsub.f32 %v2102_v36, %v2204_v58 }
 0x1ae   : > { %v720_v19 = vmax.f32 %v704_v12, 0.0  ;;  %v670_v23 = vmul.f32 0.0078125, %v628_v15  ;;  %v626_v13 = vpop.xlane.xlu0 %625  ;;  %v823_v57 = vadd.f32 %v2234_v44, %v801_v41 }
 0x1af   : > { %v719_v24 = vmax.f32 %v703_v14, 0.0  ;;  %v669_v27 = vmul.f32 0.0078125, %v626_v13  ;;  %v802_v29 = vmul.f32 %v2223_v21, %v780_v11 }
 0x1b0   : > { %v1799_v30 = vpop.eup %1798  ;;  %v752_v28 = vadd.f32 1e-05, %v720_v19  ;;  %v702_v31 = vsub.f32 %v670_v23, %v686_v17  ;;  %v839_v10 = vmax.f32 %v823_v57, 0.0 }
 0x1b1   : > { %v1801_v32 = vpop.eup %1800  ;;  %v751_v34 = vadd.f32 1e-05, %v719_v24  ;;  %v701_v35 = vsub.f32 %v669_v27, %v685_v22  ;;  %v592_v37 = vpop.xlane.xlu1 %591  ;;  %v778_v38 = vmul.f32 %v1799_v30, %v730_v16  ;;  %v824_v46 = vadd.f32 %v2234_v44, %v802_v29 }
 0x1b2   : > { %1802 = vrsqrt.f32 %v752_v28  ;;  %v718_v42 = vmax.f32 %v702_v31, 0.0  ;;  %v590_v43 = vpop.xlane.xlu0 %589  ;;  %v777_v45 = vmul.f32 %v1801_v32, %v729_v26  ;;  %v2241_v59 = vmul.f32 0.0078125, %v592_v37 }
 0x1b3   : > { %1804 = vrsqrt.f32 %v751_v34  ;;  %v717_v20 = vmax.f32 %v701_v35, 0.0  ;;  %v800_v25 = vmul.f32 %v2223_v21, %v778_v38  ;;  %v2244_v62 = vmul.f32 0.0078125, %v590_v43 }
 0x1b4   : > { %v750_v47 = vadd.f32 1e-05, %v718_v42  ;;  %v799_v48 = vmul.f32 %v2223_v21, %v777_v45  ;;  %v840_v5 = vmax.f32 %v824_v46, 0.0  ;;  %v692_v12 = vmul.f32 %v2241_v59, %v2241_v59 }
 0x1b5   : > { %v749_v49 = vadd.f32 1e-05, %v717_v20  ;;  %v588_v50 = vpop.xlane.xlu1 %587  ;;  %v822_v53 = vadd.f32 %v2234_v44, %v800_v25  ;;  %v691_v16 = vmul.f32 %v2244_v62, %v2244_v62  ;;  %v734_v24 = vsub.f32 %v2107_v39, %v2209_v1 }
 0x1b6   : > { %1806 = vrsqrt.f32 %v750_v47  ;;  %v586_v60 = vpop.xlane.xlu0 %585  ;;  %v821_v61 = vadd.f32 %v2234_v44, %v799_v48  ;;  %v2250_v14 = vmul.f32 0.0078125, %v588_v50  ;;  %v854_v23 = vpack.c.bf16 %v840_v5, %v839_v10 }
 0x1b7   : > { %1808 = vrsqrt.f32 %v749_v49  ;;  %v838_v4 = vmax.f32 %v822_v53, 0.0  ;;  %v2254_v17 = vmul.f32 0.0078125, %v586_v60  ;;  %v733_v39 = vsub.f32 %v2110_v40, %v2214_v8 }
 0x1b8   : > { %v837_v6 = vmax.f32 %v821_v61, 0.0  ;;  %v690_v26 = vmul.f32 %v2250_v14, %v2250_v14 }
 0x1b9   : > { %v640_v9 = vpop.xlane.xlu1 %639  ;;  %v689_v36 = vmul.f32 %v2254_v17, %v2254_v17 }
 0x1ba   : > { %v676_v15 = vmul.f32 0.0078125, %v640_v9  ;;  %v638_v18 = vpop.xlane.xlu0 %637  ;;  %v853_v11 = vpack.c.bf16 %v838_v4, %v837_v6 }
 0x1bb   : > { %v675_v19 = vmul.f32 0.0078125, %v638_v18 }
 0x1bc   : > { %v1803_v13 = vpop.eup %1802  ;;  %v708_v56 = vsub.f32 %v676_v15, %v692_v12  ;;  %1705 = vmatprep.mubr.bf16.mxu1 %v853_v11 }
 0x1bd   : > { %v1805_v22 = vpop.eup %1804  ;;  %v707_v27 = vsub.f32 %v675_v19, %v691_v16  ;;  %v636_v29 = vpop.xlane.xlu1 %635  ;;  %1706 = vmatmul.mubr.bf16.vlgmr.msra.gmra.mrb[0].mxu1 %v854_v23  ;;  %v784_v30 = vmul.f32 %v1803_v13, %v736_v7  ;;  %v740_v16 = vsub.f32 %v2129_v51, %v2241_v59  ;;  %v739_v51 = vsub.f32 %v2132_v52, %v2244_v62 }
 0x1be   : > { %v724_v28 = vmax.f32 %v708_v56, 0.0  ;;  %v674_v31 = vmul.f32 0.0078125, %v636_v29  ;;  %v634_v32 = vpop.xlane.xlu0 %633  ;;  %v783_v34 = vmul.f32 %v1805_v22, %v735_v33 }
 0x1bf   : > { %v723_v58 = vmax.f32 %v707_v27, 0.0  ;;  %v673_v35 = vmul.f32 0.0078125, %v634_v32  ;;  %v806_v37 = vmul.f32 %v2223_v21, %v784_v30 }
 0x1c0   : > { %v1807_v38 = vpop.eup %1806  ;;  %v756_v1 = vadd.f32 1e-05, %v724_v28  ;;  %v706_v41 = vsub.f32 %v674_v31, %v690_v26  ;;  %v805_v49 = vmul.f32 %v2223_v21, %v783_v34  ;;  %v738_v31 = vsub.f32 %v2140_v54, %v2250_v14 }
 0x1c1   : > { %v1809_v42 = vpop.eup %1808  ;;  %v755_v43 = vadd.f32 1e-05, %v723_v58  ;;  %v705_v45 = vsub.f32 %v673_v35, %v689_v36  ;;  %v600_v20 = vpop.xlane.xlu1 %599  ;;  %v782_v25 = vmul.f32 %v1807_v38, %v734_v24  ;;  %v828_v57 = vadd.f32 %v2234_v44, %v806_v37 }
 0x1c2   : > { %1810 = vrsqrt.f32 %v756_v1  ;;  %v722_v46 = vmax.f32 %v706_v41, 0.0  ;;  %v598_v47 = vpop.xlane.xlu0 %597  ;;  %v781_v48 = vmul.f32 %v1809_v42, %v733_v39  ;;  %v827_v9 = vadd.f32 %v2234_v44, %v805_v49 }
 0x1c3   : > { %1812 = vrsqrt.f32 %v755_v43  ;;  %v721_v50 = vmax.f32 %v705_v45, 0.0  ;;  %v804_v53 = vmul.f32 %v2223_v21, %v782_v25  ;;  %v844_v15 = vmax.f32 %v828_v57, 0.0 }
 0x1c4   : > { %v754_v40 = vadd.f32 1e-05, %v722_v46  ;;  %v803_v8 = vmul.f32 %v2223_v21, %v781_v48  ;;  %v843_v11 = vmax.f32 %v827_v9, 0.0  ;;  %v2280_v23 = vmul.f32 0.0078125, %v600_v20 }
 0x1c5   : > { %v753_v60 = vadd.f32 1e-05, %v721_v50  ;;  %v596_v61 = vpop.xlane.xlu1 %595  ;;  %v826_v4 = vadd.f32 %v2234_v44, %v804_v53  ;;  %v2284_v24 = vmul.f32 0.0078125, %v598_v47  ;;  %v737_v54 = vsub.f32 %v2143_v55, %v2254_v17 }
 0x1c6   : > { %1814 = vrsqrt.f32 %v754_v40  ;;  %v2272_v5 = vmul.f32 0.0078125, %v596_v61  ;;  %v594_v6 = vpop.xlane.xlu0 %593  ;;  %v825_v7 = vadd.f32 %v2234_v44, %v803_v8  ;;  %v856_v30 = vpack.c.bf16 %v844_v15, %v843_v11 }
 0x1c7   : > { %1816 = vrsqrt.f32 %v753_v60  ;;  %v2276_v10 = vmul.f32 0.0078125, %v594_v6  ;;  %v842_v12 = vmax.f32 %v826_v4, 0.0  ;;  %v696_v58 = vmul.f32 %v2280_v23, %v2280_v23 }
 0x1c8   : > { %v841_v18 = vmax.f32 %v825_v7, 0.0  ;;  %v694_v13 = vmul.f32 %v2272_v5, %v2272_v5  ;;  %v695_v52 = vmul.f32 %v2284_v24, %v2284_v24  ;;  %v742_v15 = vsub.f32 %v2176_v2, %v2272_v5 }
 0x1c9   : > { %v644_v19 = vpop.xlane.xlu1 %643  ;;  %v693_v27 = vmul.f32 %v2276_v10, %v2276_v10 }
 0x1ca   : > { %v678_v33 = vmul.f32 0.0078125, %v644_v19  ;;  %v642_v56 = vpop.xlane.xlu0 %641  ;;  %v855_v22 = vpack.c.bf16 %v842_v12, %v841_v18 }
 0x1cb   : > { %v677_v29 = vmul.f32 0.0078125, %v642_v56  ;;  %v744_v56 = vsub.f32 %v2165_v63, %v2280_v23 }
 0x1cc   : > { %v1811_v26 = vpop.eup %1810  ;;  %v710_v59 = vsub.f32 %v678_v33, %v694_v13  ;;  %1709 = vmatprep.mubr.bf16.mxu1 %v855_v22 }
 0x1cd   : > { %v1813_v28 = vpop.eup %1812  ;;  %v709_v32 = vsub.f32 %v677_v29, %v693_v27  ;;  %v648_v34 = vpop.xlane.xlu1 %647  ;;  %1710 = vmatmul.mubr.bf16.gmra.mrb[4].mxu1 %v856_v30  ;;  %v788_v36 = vmul.f32 %v1811_v26, %v740_v16  ;;  %v741_v16 = vsub.f32 %v2179_v3, %v2276_v10  ;;  %v743_v29 = vsub.f32 %v2168_v0, %v2284_v24 }
 0x1ce   : > { %v726_v35 = vmax.f32 %v710_v59, 0.0  ;;  %v680_v37 = vmul.f32 0.0078125, %v648_v34  ;;  %v646_v38 = vpop.xlane.xlu0 %645  ;;  %v787_v39 = vmul.f32 %v1813_v28, %v739_v51 }
 0x1cf   : > { %v725_v62 = vmax.f32 %v709_v32, 0.0  ;;  %v679_v1 = vmul.f32 0.0078125, %v646_v38  ;;  %v810_v41 = vmul.f32 %v2223_v21, %v788_v36  ;;  %v2325_v36 = vld [vmem:[%s2639_s6] ss:$0 sm:$0xff] }
 0x1d0   : > { %v1815_v42 = vpop.eup %1814  ;;  %v758_v14 = vadd.f32 1e-05, %v726_v35  ;;  %v712_v43 = vsub.f32 %v680_v37, %v696_v58  ;;  %v809_v45 = vmul.f32 %v2223_v21, %v787_v39 }
 0x1d1   : > { %v1817_v20 = vpop.eup %1816  ;;  %v757_v25 = vadd.f32 1e-05, %v725_v62  ;;  %v711_v46 = vsub.f32 %v679_v1, %v695_v52  ;;  %v786_v47 = vmul.f32 %v1815_v42, %v738_v31  ;;  %v832_v50 = vadd.f32 %v2234_v44, %v810_v41 }
 0x1d2   : > { %1818 = vrsqrt.f32 %v758_v14  ;;  %v728_v48 = vmax.f32 %v712_v43, 0.0  ;;  %v785_v49 = vmul.f32 %v1817_v20, %v737_v54  ;;  %v831_v40 = vadd.f32 %v2234_v44, %v809_v45 }
 0x1d3   : > { %1820 = vrsqrt.f32 %v757_v25  ;;  %v727_v53 = vmax.f32 %v711_v46, 0.0  ;;  %v808_v57 = vmul.f32 %v2223_v21, %v786_v47  ;;  %v848_v7 = vmax.f32 %v832_v50, 0.0 }
 0x1d4   : > { %v760_v55 = vadd.f32 1e-05, %v728_v48  ;;  %v807_v17 = vmul.f32 %v2223_v21, %v785_v49  ;;  %v847_v6 = vmax.f32 %v831_v40, 0.0 }
 0x1d5   : > { %v759_v8 = vadd.f32 1e-05, %v727_v53  ;;  %v830_v60 = vadd.f32 %v2234_v44, %v808_v57 }
 0x1d6   : > { %1822 = vrsqrt.f32 %v760_v55  ;;  %v829_v61 = vadd.f32 %v2234_v44, %v807_v17  ;;  %v858_v18 = vpack.c.bf16 %v848_v7, %v847_v6 }
 0x1d7   : > { %1824 = vrsqrt.f32 %v759_v8  ;;  %v846_v4 = vmax.f32 %v830_v60, 0.0 }
 0x1d8   : > { %v845_v9 = vmax.f32 %v829_v61, 0.0 }
 0x1da   : > { %v857_v12 = vpack.c.bf16 %v846_v4, %v845_v9 }
 0x1dc   : > { %v1819_v11 = vpop.eup %1818  ;;  %1713 = vmatprep.mubr.bf16.mxu1 %v857_v12 }
 0x1dd   : > { %v1821_v19 = vpop.eup %1820  ;;  %1714 = vmatmul.mubr.bf16.gmra.mrb[8].mxu1 %v858_v18  ;;  %v790_v13 = vmul.f32 %v1819_v11, %v742_v15 }
 0x1de   : > { %v789_v33 = vmul.f32 %v1821_v19, %v741_v16 }
 0x1df   : > { %v812_v22 = vmul.f32 %v2223_v21, %v790_v13 }
 0x1e0   : > { %v1823_v27 = vpop.eup %1822  ;;  %v811_v2 = vmul.f32 %v2223_v21, %v789_v33 }
 0x1e1   : > { %v1825_v5 = vpop.eup %1824  ;;  %v834_v30 = vadd.f32 %v2234_v44, %v812_v22  ;;  %v792_v3 = vmul.f32 %v1823_v27, %v744_v56 }
 0x1e2   : > { %v833_v10 = vadd.f32 %v2234_v44, %v811_v2  ;;  %v791_v26 = vmul.f32 %v1825_v5, %v743_v29 }
 0x1e3   : > { %v850_v51 = vmax.f32 %v834_v30, 0.0  ;;  %v814_v59 = vmul.f32 %v2223_v21, %v792_v3 }
 0x1e4   : > { %v849_v28 = vmax.f32 %v833_v10, 0.0  ;;  %v813_v63 = vmul.f32 %v2223_v21, %v791_v26 }
 0x1e5   : > { %v836_v23 = vadd.f32 %v2234_v44, %v814_v59 }
 0x1e6   : > { %v859_v31 = vpack.c.bf16 %v850_v51, %v849_v28  ;;  %v835_v0 = vadd.f32 %v2234_v44, %v813_v63 }
 0x1e7   : > { %v852_v24 = vmax.f32 %v836_v23, 0.0 }
 0x1e8   : > { %1717 = vmatprep.mubr.bf16.mxu1 %v859_v31  ;;  %v851_v32 = vmax.f32 %v835_v0, 0.0 }
 0x1ea   : > { %v860_v34 = vpack.c.bf16 %v852_v24, %v851_v32 }
 0x1ec   : > { %1718 = vmatmul.mubr.bf16.gmra.mrb[12].mxu1 %v860_v34 }
 0x290   : > { %v1707_v58 = vpop.f32.mrb[0].mxu1 }
 0x291   : > { %v2328_v35 = vadd.f32 %v1707_v58, %v2325_v36  ;;  %v966_v21 = vpop.f32.mrb[1].mxu1 }
 0x292   : > { %v1708_v37 = vpop.f32.mrb[2].mxu1  ;;  %v2335_v39 = vadd.f32 %v2325_v36, %v966_v21 }
 0x293   : > { %v2331_v38 = vadd.f32 %v1708_v37, %v2325_v36  ;;  %1035 = vadd.xlane.f32.xlu0 %v2328_v35  ;;  %v969_v44 = vpop.f32.mrb[3].mxu1  ;;  %v1065_v62 = vmul.f32 %v2328_v35, %v2328_v35 }
 0x294   : > { %v2339_v52 = vadd.f32 %v2325_v36, %v969_v44  ;;  %v1063_v41 = vmul.f32 %v2335_v39, %v2335_v39 }
 0x295   : > { %1037 = vadd.xlane.f32.xlu1 %v2331_v38  ;;  %v1066_v1 = vmul.f32 %v2331_v38, %v2331_v38 }
 0x296   : > { %v1064_v42 = vmul.f32 %v2339_v52, %v2339_v52 }
 0x297   : > { %1031 = vadd.xlane.f32.xlu0 %v2335_v39 }
 0x299   : > { %1033 = vadd.xlane.f32.xlu1 %v2339_v52 }
 0x29b   : > { %1083 = vadd.xlane.f32.xlu0 %v1065_v62 }
 0x29d   : > { %1085 = vadd.xlane.f32.xlu1 %v1066_v1 }
 0x29f   : > { %1079 = vadd.xlane.f32.xlu0 %v1063_v41 }
 0x2a0   : > { %v1711_v54 = vpop.f32.mrb[4].mxu1 }
 0x2a1   : > { %v2352_v14 = vadd.f32 %v1711_v54, %v2325_v36  ;;  %1081 = vadd.xlane.f32.xlu1 %v1064_v42  ;;  %v982_v43 = vpop.f32.mrb[5].mxu1 }
 0x2a2   : > { %v1712_v45 = vpop.f32.mrb[6].mxu1  ;;  %v2359_v46 = vadd.f32 %v2325_v36, %v982_v43 }
 0x2a3   : > { %v2355_v20 = vadd.f32 %v1712_v45, %v2325_v36  ;;  %1043 = vadd.xlane.f32.xlu0 %v2352_v14  ;;  %v985_v25 = vpop.f32.mrb[7].mxu1  ;;  %v1069_v48 = vmul.f32 %v2352_v14, %v2352_v14 }
 0x2a4   : > { %v2363_v47 = vadd.f32 %v2325_v36, %v985_v25  ;;  %v1067_v50 = vmul.f32 %v2359_v46, %v2359_v46 }
 0x2a5   : > { %1045 = vadd.xlane.f32.xlu1 %v2355_v20  ;;  %v1070_v49 = vmul.f32 %v2355_v20, %v2355_v20 }
 0x2a6   : > { %v1068_v53 = vmul.f32 %v2363_v47, %v2363_v47 }
 0x2a7   : > { %1039 = vadd.xlane.f32.xlu0 %v2359_v46 }
 0x2a9   : > { %1041 = vadd.xlane.f32.xlu1 %v2363_v47 }
 0x2ab   : > { %1091 = vadd.xlane.f32.xlu0 %v1069_v48 }
 0x2ad   : > { %1093 = vadd.xlane.f32.xlu1 %v1070_v49 }
 0x2af   : > { %1087 = vadd.xlane.f32.xlu0 %v1067_v50 }
 0x2b0   : > { %v1715_v57 = vpop.f32.mrb[8].mxu1 }
 0x2b1   : > { %v2376_v40 = vadd.f32 %v1715_v57, %v2325_v36  ;;  %1089 = vadd.xlane.f32.xlu1 %v1068_v53  ;;  %v998_v55 = vpop.f32.mrb[9].mxu1 }
 0x2b2   : > { %v1716_v17 = vpop.f32.mrb[10].mxu1  ;;  %v2383_v61 = vadd.f32 %v2325_v36, %v998_v55 }
 0x2b3   : > { %v2379_v8 = vadd.f32 %v1716_v17, %v2325_v36  ;;  %1051 = vadd.xlane.f32.xlu0 %v2376_v40  ;;  %v1001_v60 = vpop.f32.mrb[11].mxu1  ;;  %v1073_v6 = vmul.f32 %v2376_v40, %v2376_v40 }
 0x2b4   : > { %v2387_v4 = vadd.f32 %v2325_v36, %v1001_v60  ;;  %v1071_v9 = vmul.f32 %v2383_v61, %v2383_v61 }
 0x2b5   : > { %1053 = vadd.xlane.f32.xlu1 %v2379_v8  ;;  %v1074_v7 = vmul.f32 %v2379_v8, %v2379_v8 }
 0x2b6   : > { %v1072_v15 = vmul.f32 %v2387_v4, %v2387_v4 }
 0x2b7   : > { %1047 = vadd.xlane.f32.xlu0 %v2383_v61 }
 0x2b9   : > { %1049 = vadd.xlane.f32.xlu1 %v2387_v4 }
 0x2bb   : > { %1099 = vadd.xlane.f32.xlu0 %v1073_v6 }
 0x2bd   : > { %1101 = vadd.xlane.f32.xlu1 %v1074_v7 }
 0x2bf   : > { %1095 = vadd.xlane.f32.xlu0 %v1071_v9  ;;  %v1719_v12 = vpop.f32.mrb[12].mxu1 }
 0x2c0   : > { %v2400_v18 = vadd.f32 %v1719_v12, %v2325_v36  ;;  %v1014_v11 = vpop.f32.mrb[13].mxu1 }
 0x2c1   : > { %1097 = vadd.xlane.f32.xlu1 %v1072_v15  ;;  %v1720_v16 = vpop.f32.mrb[14].mxu1  ;;  %v2407_v33 = vadd.f32 %v2325_v36, %v1014_v11 }
 0x2c2   : > { %v2403_v19 = vadd.f32 %v1720_v16, %v2325_v36  ;;  %v1017_v13 = vpop.f32.mrb[15].mxu1  ;;  %v1077_v29 = vmul.f32 %v2400_v18, %v2400_v18 }
 0x2c3   : > { %1059 = vadd.xlane.f32.xlu0 %v2400_v18  ;;  %v2411_v56 = vadd.f32 %v2325_v36, %v1017_v13  ;;  %v1075_v22 = vmul.f32 %v2407_v33, %v2407_v33 }
 0x2c4   : > { %v1078_v2 = vmul.f32 %v2403_v19, %v2403_v19 }
 0x2c5   : > { %1061 = vadd.xlane.f32.xlu1 %v2403_v19  ;;  %v1076_v27 = vmul.f32 %v2411_v56, %v2411_v56 }
 0x2c7   : > { %1055 = vadd.xlane.f32.xlu0 %v2407_v33 }
 0x2c9   : > { %1057 = vadd.xlane.f32.xlu1 %v2411_v56 }
 0x2cb   : > { %1103 = vadd.xlane.f32.xlu0 %v1075_v22 }
 0x2cd   : > { %1105 = vadd.xlane.f32.xlu1 %v1076_v27 }
 0x2cf   : > { %1107 = vadd.xlane.f32.xlu0 %v1077_v29  ;;  %v2447_v29 = vld [vmem:[%s2044_s16] sm:$0xff]  }
 0x2d1   : > { %1109 = vadd.xlane.f32.xlu1 %v1078_v2  ;;  %v1299_v2 = vunpack.c.l.bf16 %v2447_v29 }
 0x320   : > { %v1036_v5 = vpop.xlane.xlu0 %1035 }
 0x321   : > { %v1113_v10 = vmul.f32 0.0078125, %v1036_v5  ;;  %v2453_v5 = vld [vmem:[%s2640_s7] ss:$0 sm:$0xff] }
 0x322   : > { %v1038_v30 = vpop.xlane.xlu1 %1037 }
 0x323   : > { %v2423_v51 = vmul.f32 0.0078125, %v1038_v30  ;;  %v1145_v28 = vmul.f32 %v1113_v10, %v1113_v10  ;;  %v1193_v16 = vsub.f32 %v2328_v35, %v1113_v10 }
 0x324   : > { %v1032_v3 = vpop.xlane.xlu0 %1031 }
 0x325   : > { %v2425_v63 = vmul.f32 0.0078125, %v1032_v3  ;;  %v1146_v24 = vmul.f32 %v2423_v51, %v2423_v51 }
 0x326   : > { %v1034_v26 = vpop.xlane.xlu1 %1033 }
 0x327   : > { %v2427_v31 = vmul.f32 0.0078125, %v1034_v26  ;;  %v1143_v58 = vmul.f32 %v2425_v63, %v2425_v63 }
 0x328   : > { %v1084_v59 = vpop.xlane.xlu0 %1083 }
 0x329   : > { %v1129_v23 = vmul.f32 0.0078125, %v1084_v59  ;;  %v1144_v62 = vmul.f32 %v2427_v31, %v2427_v31  ;;  %v1859_v59 = vld [vmem:[%s2044_s16 + $0x8] sm:$0xff]  }
 0x32a   : > { %v1086_v0 = vpop.xlane.xlu1 %1085  ;;  %v1301_v35 = vunpack.c.l.bf16 %v1859_v59  ;;  %v1302_v10 = vunpack.c.h.bf16 %v1859_v59 }
 0x32b   : > { %v1161_v32 = vsub.f32 %v1129_v23, %v1145_v28  ;;  %v1130_v34 = vmul.f32 0.0078125, %v1086_v0  ;;  %v1194_v28 = vsub.f32 %v2331_v38, %v2423_v51 }
 0x32c   : > { %v1080_v36 = vpop.xlane.xlu0 %1079 }
 0x32d   : > { %v1177_v21 = vmax.f32 %v1161_v32, 0.0  ;;  %v1162_v37 = vsub.f32 %v1130_v34, %v1146_v24  ;;  %v1127_v44 = vmul.f32 0.0078125, %v1080_v36  ;;  %v2463_v32 = vld [vmem:[%s2641_s8] ss:$0 sm:$0xff] }
 0x32e   : > { %v1082_v1 = vpop.xlane.xlu1 %1081 }
 0x32f   : > { %v1209_v41 = vadd.f32 1e-05, %v1177_v21  ;;  %v1178_v42 = vmax.f32 %v1162_v37, 0.0  ;;  %v1159_v54 = vsub.f32 %v1127_v44, %v1143_v58  ;;  %v1128_v43 = vmul.f32 0.0078125, %v1082_v1 }
 0x330   : > { %v1044_v45 = vpop.xlane.xlu0 %1043  ;;  %v1191_v37 = vsub.f32 %v2335_v39, %v2425_v63 }
 0x331   : > { %1826 = vrsqrt.f32 %v1209_v41  ;;  %v1210_v25 = vadd.f32 1e-05, %v1178_v42  ;;  %v1175_v48 = vmax.f32 %v1159_v54, 0.0  ;;  %v1160_v49 = vsub.f32 %v1128_v43, %v1144_v62 }
 0x332   : > { %v1046_v50 = vpop.xlane.xlu1 %1045  ;;  %v2435_v60 = vmul.f32 0.0078125, %v1044_v45  ;;  %v1192_v45 = vsub.f32 %v2339_v52, %v2427_v31 }
 0x333   : > { %1828 = vrsqrt.f32 %v1210_v25  ;;  %v1207_v53 = vadd.f32 1e-05, %v1175_v48  ;;  %v1176_v57 = vmax.f32 %v1160_v49, 0.0  ;;  %v2437_v7 = vmul.f32 0.0078125, %v1046_v50 }
 0x334   : > { %v1040_v55 = vpop.xlane.xlu0 %1039  ;;  %v1149_v12 = vmul.f32 %v2435_v60, %v2435_v60 }
 0x335   : > { %1830 = vrsqrt.f32 %v1207_v53  ;;  %v1208_v17 = vadd.f32 1e-05, %v1176_v57  ;;  %v2441_v15 = vmul.f32 0.0078125, %v1040_v55  ;;  %v1150_v30 = vmul.f32 %v2437_v7, %v2437_v7 }
 0x336   : > { %v1042_v6 = vpop.xlane.xlu1 %1041 }
 0x337   : > { %1832 = vrsqrt.f32 %v1208_v17  ;;  %v2444_v13 = vmul.f32 0.0078125, %v1042_v6  ;;  %v1147_v34 = vmul.f32 %v2441_v15, %v2441_v15 }
 0x338   : > { %v1092_v9 = vpop.xlane.xlu0 %1091 }
 0x339   : > { %v1133_v11 = vmul.f32 0.0078125, %v1092_v9  ;;  %v1148_v44 = vmul.f32 %v2444_v13, %v2444_v13 }
 0x33a   : > { %v1094_v22 = vpop.xlane.xlu1 %1093 }
 0x33b   : > { %v1827_v27 = vpop.eup %1826  ;;  %v1165_v3 = vsub.f32 %v1133_v11, %v1149_v12  ;;  %v1134_v26 = vmul.f32 0.0078125, %v1094_v22  ;;  %v1300_v11 = vunpack.c.h.bf16 %v2447_v29 }
 0x33c   : > { %v1241_v23 = vmul.f32 %v1827_v27, %v1193_v16  ;;  %v1088_v0 = vpop.xlane.xlu0 %1087 }
 0x33d   : > { %v1829_v24 = vpop.eup %1828  ;;  %v1181_v36 = vmax.f32 %v1165_v3, 0.0  ;;  %v1166_v58 = vsub.f32 %v1134_v26, %v1150_v30  ;;  %v1131_v21 = vmul.f32 0.0078125, %v1088_v0 }
 0x33e   : > { %v1263_v38 = vmul.f32 %v2453_v5, %v1241_v23  ;;  %v1242_v51 = vmul.f32 %v1829_v24, %v1194_v28  ;;  %v1090_v62 = vpop.xlane.xlu1 %1089 }
 0x33f   : > { %v1831_v1 = vpop.eup %1830  ;;  %v1213_v41 = vadd.f32 1e-05, %v1181_v36  ;;  %v1182_v42 = vmax.f32 %v1166_v58, 0.0  ;;  %v1163_v54 = vsub.f32 %v1131_v21, %v1147_v34  ;;  %v1132_v43 = vmul.f32 0.0078125, %v1090_v62  ;;  %v1860_v36 = vld [vmem:[%s2044_s16 + $0x18] sm:$0xff]  }
 0x340   : > { %v1285_v25 = vadd.f32 %v2463_v32, %v1263_v38  ;;  %v1264_v39 = vmul.f32 %v2453_v5, %v1242_v51  ;;  %v1239_v63 = vmul.f32 %v1831_v1, %v1191_v37  ;;  %v1052_v48 = vpop.xlane.xlu0 %1051  ;;  %v1305_v58 = vunpack.c.l.bf16 %v1860_v36 }
 0x341   : > { %v1833_v49 = vpop.eup %1832  ;;  %1834 = vrsqrt.f32 %v1213_v41  ;;  %v1214_v50 = vadd.f32 1e-05, %v1182_v42  ;;  %v1179_v53 = vmax.f32 %v1163_v54, 0.0  ;;  %v1164_v57 = vsub.f32 %v1132_v43, %v1148_v44 }
 0x342   : > { %v1317_v55 = vadd.f32 %v1301_v35, %v1285_v25  ;;  %v1286_v17 = vadd.f32 %v2463_v32, %v1264_v39  ;;  %v1261_v6 = vmul.f32 %v2453_v5, %v1239_v63  ;;  %v1240_v9 = vmul.f32 %v1833_v49, %v1192_v45  ;;  %v1054_v52 = vpop.xlane.xlu1 %1053 }
 0x343   : > { %1836 = vrsqrt.f32 %v1214_v50  ;;  %v1211_v31 = vadd.f32 1e-05, %v1179_v53  ;;  %v1180_v12 = vmax.f32 %v1164_v57, 0.0  ;;  %v2484_v26 = vmul.f32 0.0078125, %v1052_v48 }
 0x344   : > { %v1318_v16 = vadd.f32 %v1302_v10, %v1286_v17  ;;  %v1283_v22 = vadd.f32 %v2463_v32, %v1261_v6  ;;  %v1262_v27 = vmul.f32 %v2453_v5, %v1240_v9  ;;  %v1048_v30 = vpop.xlane.xlu0 %1047  ;;  %v1333_v59 = vmax.f32 %v1317_v55, 0.0 }
 0x345   : > { %1838 = vrsqrt.f32 %v1211_v31  ;;  %v1212_v3 = vadd.f32 1e-05, %v1180_v12  ;;  %v2487_v29 = vmul.f32 0.0078125, %v1054_v52  ;;  %v1197_v21 = vsub.f32 %v2352_v14, %v2435_v60 }
 0x346   : > { %v1334_v35 = vmax.f32 %v1318_v16, 0.0  ;;  %v1315_v28 = vadd.f32 %v1299_v2, %v1283_v22  ;;  %v1284_v23 = vadd.f32 %v2463_v32, %v1262_v27  ;;  %v1050_v0 = vpop.xlane.xlu1 %1049  ;;  %v2492_v37 = vmul.f32 0.0078125, %v1048_v30  ;;  %v1861_v22 = vld [vmem:[%s2044_s16 + $0x10] sm:$0xff]  }
 0x347   : > { %1840 = vrsqrt.f32 %v1212_v3  ;;  %v1153_v51 = vmul.f32 %v2484_v26, %v2484_v26  ;;  %v1306_v41 = vunpack.c.h.bf16 %v1860_v36  ;;  %v1154_v42 = vmul.f32 %v2487_v29, %v2487_v29 }
 0x348   : > { %v1586_v10 = vpack.c.bf16 %v1334_v35, %v1333_v59  ;;  %v1316_v24 = vadd.f32 %v1300_v11, %v1284_v23  ;;  %v1100_v34 = vpop.xlane.xlu0 %1099  ;;  %v1331_v2 = vmax.f32 %v1315_v28, 0.0  ;;  %v2501_v14 = vmul.f32 0.0078125, %v1050_v0 }
 0x349   : > { %v1137_v44 = vmul.f32 0.0078125, %v1100_v34  ;;  %v1198_v43 = vsub.f32 %v2355_v20, %v2437_v7  ;;  %v1195_v48 = vsub.f32 %v2359_v46, %v2441_v15  ;;  %v1151_v49 = vmul.f32 %v2492_v37, %v2492_v37 }
 0x34a   : > { %1618 = vst [vmem:[%s2494_s27 + $0x8] sm:$0xff] %v1586_v10   ;;  %v1332_v38 = vmax.f32 %v1316_v24, 0.0  ;;  %v1102_v62 = vpop.xlane.xlu1 %1101  ;;  %v1196_v57 = vsub.f32 %v2363_v47, %v2444_v13  ;;  %v1152_v9 = vmul.f32 %v2501_v14, %v2501_v14  ;;  %v1303_v27 = vunpack.c.l.bf16 %v1861_v22 }
 0x34b   : > { %v1835_v1 = vpop.eup %1834  ;;  %v1138_v60 = vmul.f32 0.0078125, %v1102_v62  ;;  %v1169_v25 = vsub.f32 %v1137_v44, %v1153_v51  ;;  %v1304_v36 = vunpack.c.h.bf16 %v1861_v22 }
 0x34c   : > { %v1581_v54 = vpack.c.bf16 %v1332_v38, %v1331_v2  ;;  %v1245_v45 = vmul.f32 %v1835_v1, %v1197_v21  ;;  %v1096_v39 = vpop.xlane.xlu0 %1095 }
 0x34d   : > { %v1837_v63 = vpop.eup %1836  ;;  %v1170_v50 = vsub.f32 %v1138_v60, %v1154_v42  ;;  %v1135_v53 = vmul.f32 0.0078125, %v1096_v39  ;;  %v1185_v7 = vmax.f32 %v1169_v25, 0.0 }
 0x34e   : > { %1582 = vst [vmem:[%s2494_s27] sm:$0xff] %v1581_v54   ;;  %v1267_v55 = vmul.f32 %v2453_v5, %v1245_v45  ;;  %v1246_v20 = vmul.f32 %v1837_v63, %v1198_v43  ;;  %v1098_v17 = vpop.xlane.xlu1 %1097 }
 0x34f   : > { %v1839_v6 = vpop.eup %1838  ;;  %v1186_v46 = vmax.f32 %v1170_v50, 0.0  ;;  %v1167_v15 = vsub.f32 %v1135_v53, %v1151_v49  ;;  %v1136_v52 = vmul.f32 0.0078125, %v1098_v17  ;;  %v1217_v16 = vadd.f32 1e-05, %v1185_v7 }
 0x350   : > { %v1289_v31 = vadd.f32 %v2463_v32, %v1267_v55  ;;  %v1268_v12 = vmul.f32 %v2453_v5, %v1246_v20  ;;  %v1243_v11 = vmul.f32 %v1839_v6, %v1195_v48  ;;  %v1060_v47 = vpop.xlane.xlu0 %1059  ;;  %v1863_v6 = vld [vmem:[%s2044_s16 + $0x28] sm:$0xff]  }
 0x351   : > { %v1841_v13 = vpop.eup %1840  ;;  %v1218_v30 = vadd.f32 1e-05, %v1186_v46  ;;  %v1183_v3 = vmax.f32 %v1167_v15, 0.0  ;;  %v1168_v59 = vsub.f32 %v1136_v52, %v1152_v9  ;;  %1842 = vrsqrt.f32 %v1217_v16 }
 0x352   : > { %v1321_v35 = vadd.f32 %v1305_v58, %v1289_v31  ;;  %v1290_v28 = vadd.f32 %v2463_v32, %v1268_v12  ;;  %v1265_v23 = vmul.f32 %v2453_v5, %v1243_v11  ;;  %v1244_v0 = vmul.f32 %v1841_v13, %v1196_v57  ;;  %v1062_v10 = vpop.xlane.xlu1 %1061  ;;  %v1862_v57 = vld [vmem:[%s2044_s16 + $0x20] sm:$0xff]  }
 0x353   : > { %v1215_v24 = vadd.f32 1e-05, %v1183_v3  ;;  %v1184_v34 = vmax.f32 %v1168_v59, 0.0  ;;  %1844 = vrsqrt.f32 %v1218_v30  ;;  %v2527_v39 = vmul.f32 0.0078125, %v1060_v47 }
 0x354   : > { %v1322_v21 = vadd.f32 %v1306_v41, %v1290_v28  ;;  %v1287_v2 = vadd.f32 %v2463_v32, %v1265_v23  ;;  %v1266_v38 = vmul.f32 %v2453_v5, %v1244_v0  ;;  %v1056_v51 = vpop.xlane.xlu0 %1055  ;;  %v1337_v44 = vmax.f32 %v1321_v35, 0.0 }
 0x355   : > { %v1216_v58 = vadd.f32 1e-05, %v1184_v34  ;;  %1846 = vrsqrt.f32 %v1215_v24  ;;  %v2523_v54 = vmul.f32 0.0078125, %v1056_v51  ;;  %v1307_v55 = vunpack.c.l.bf16 %v1862_v57 }
 0x356   : > { %v1338_v62 = vmax.f32 %v1322_v21, 0.0  ;;  %v1319_v1 = vadd.f32 %v1303_v27, %v1287_v2  ;;  %v1288_v42 = vadd.f32 %v2463_v32, %v1266_v38  ;;  %v1058_v60 = vpop.xlane.xlu1 %1057  ;;  %v1309_v9 = vunpack.c.l.bf16 %v1863_v6 }
 0x357   : > { %1848 = vrsqrt.f32 %v1216_v58  ;;  %v2525_v45 = vmul.f32 0.0078125, %v1058_v60  ;;  %v1155_v63 = vmul.f32 %v2523_v54, %v2523_v54  ;;  %v1201_v15 = vsub.f32 %v2376_v40, %v2484_v26 }
 0x358   : > { %v1596_v41 = vpack.c.bf16 %v1338_v62, %v1337_v44  ;;  %v1320_v43 = vadd.f32 %v1304_v36, %v1288_v42  ;;  %v1104_v25 = vpop.xlane.xlu0 %1103  ;;  %v1335_v49 = vmax.f32 %v1319_v1, 0.0  ;;  %v2538_v52 = vmul.f32 0.0078125, %v1062_v10 }
 0x359   : > { %v1139_v48 = vmul.f32 0.0078125, %v1104_v25  ;;  %v1156_v20 = vmul.f32 %v2525_v45, %v2525_v45  ;;  %v1157_v11 = vmul.f32 %v2527_v39, %v2527_v39  ;;  %v1310_v22 = vunpack.c.h.bf16 %v1863_v6 }
 0x35a   : > { %1620 = vst [vmem:[%s2494_s27 + $0x18] sm:$0xff] %v1596_v41   ;;  %v1336_v50 = vmax.f32 %v1320_v43, 0.0  ;;  %v1106_v53 = vpop.xlane.xlu1 %1105  ;;  %v1202_v27 = vsub.f32 %v2379_v8, %v2487_v29  ;;  %v1199_v30 = vsub.f32 %v2383_v61, %v2492_v37  ;;  %v1200_v10 = vsub.f32 %v2387_v4, %v2501_v14 }
 0x35b   : > { %v1171_v7 = vsub.f32 %v1139_v48, %v1155_v63  ;;  %v1140_v17 = vmul.f32 0.0078125, %v1106_v53  ;;  %v1843_v12 = vpop.eup %1842  ;;  %v1158_v8 = vmul.f32 %v2538_v52, %v2538_v52  ;;  %v1308_v44 = vunpack.c.h.bf16 %v1862_v57 }
 0x35c   : > { %v1591_v46 = vpack.c.bf16 %v1336_v50, %v1335_v49  ;;  %v1108_v31 = vpop.xlane.xlu0 %1107  ;;  %v1249_v3 = vmul.f32 %v1843_v12, %v1201_v15  ;;  %v1205_v12 = vsub.f32 %v2400_v18, %v2527_v39  ;;  %v1865_v39 = vld [vmem:[%s2044_s16 + $0x38] sm:$0xff]  }
 0x35d   : > { %v1187_v16 = vmax.f32 %v1171_v7, 0.0  ;;  %v1172_v47 = vsub.f32 %v1140_v17, %v1156_v20  ;;  %v1141_v13 = vmul.f32 0.0078125, %v1108_v31  ;;  %v1845_v26 = vpop.eup %1844  ;;  %v1203_v7 = vsub.f32 %v2407_v33, %v2523_v54 }
 0x35e   : > { %1619 = vst [vmem:[%s2494_s27 + $0x10] sm:$0xff] %v1591_v46   ;;  %v1110_v40 = vpop.xlane.xlu1 %1109  ;;  %v1271_v24 = vmul.f32 %v2453_v5, %v1249_v3  ;;  %v1250_v34 = vmul.f32 %v1845_v26, %v1202_v27  ;;  %v1313_v3 = vunpack.c.l.bf16 %v1865_v39 }
 0x35f   : > { %v1219_v59 = vadd.f32 1e-05, %v1187_v16  ;;  %v1188_v35 = vmax.f32 %v1172_v47, 0.0  ;;  %v1173_v28 = vsub.f32 %v1141_v13, %v1157_v11  ;;  %v1142_v23 = vmul.f32 0.0078125, %v1110_v40  ;;  %v1847_v0 = vpop.eup %1846 }
 0x360   : > { %v1247_v36 = vmul.f32 %v1847_v0, %v1199_v30  ;;  %v1293_v21 = vadd.f32 %v2463_v32, %v1271_v24  ;;  %v1272_v2 = vmul.f32 %v2453_v5, %v1250_v34 }
 0x361   : > { %v1849_v29 = vpop.eup %1848  ;;  %1850 = vrsqrt.f32 %v1219_v59  ;;  %v1220_v61 = vadd.f32 1e-05, %v1188_v35  ;;  %v1189_v37 = vmax.f32 %v1173_v28, 0.0  ;;  %v1174_v51 = vsub.f32 %v1142_v23, %v1158_v8 }
 0x362   : > { %v1248_v38 = vmul.f32 %v1849_v29, %v1200_v10  ;;  %v1269_v4 = vmul.f32 %v2453_v5, %v1247_v36  ;;  %v1325_v58 = vadd.f32 %v1309_v9, %v1293_v21  ;;  %v1294_v62 = vadd.f32 %v2463_v32, %v1272_v2 }
 0x363   : > { %1852 = vrsqrt.f32 %v1220_v61  ;;  %v1221_v14 = vadd.f32 1e-05, %v1189_v37  ;;  %v1190_v42 = vmax.f32 %v1174_v51, 0.0  ;;  %v1204_v9 = vsub.f32 %v2411_v56, %v2525_v45 }
 0x364   : > { %v1270_v1 = vmul.f32 %v2453_v5, %v1248_v38  ;;  %v1291_v60 = vadd.f32 %v2463_v32, %v1269_v4  ;;  %v1326_v41 = vadd.f32 %v1310_v22, %v1294_v62  ;;  %v1341_v48 = vmax.f32 %v1325_v58, 0.0 }
 0x365   : > { %1854 = vrsqrt.f32 %v1221_v14  ;;  %v1222_v25 = vadd.f32 1e-05, %v1190_v42  ;;  %v1206_v56 = vsub.f32 %v2403_v19, %v2538_v52  ;;  %v1314_v35 = vunpack.c.h.bf16 %v1865_v39 }
 0x366   : > { %v1292_v43 = vadd.f32 %v2463_v32, %v1270_v1  ;;  %v1323_v63 = vadd.f32 %v1307_v55, %v1291_v60  ;;  %v1342_v49 = vmax.f32 %v1326_v41, 0.0  ;;  %v1864_v55 = vld [vmem:[%s2044_s16 + $0x30] sm:$0xff]   ;;  %s1441_s16 = sshll.u32 %s2494_s27, 4  ;;  %s2587_s16 = int_to_ptr.vmem [resolvable:$true] %s1441_s16 }
 0x367   : > { %1856 = vrsqrt.f32 %v1222_v25  ;;  %v1311_v31 = vunpack.c.l.bf16 %v1864_v55  ;;  %v1312_v33 = vunpack.c.h.bf16 %v1864_v55  ;;  %s1866_s13 = scalar_lea.vmem %s2587_s16, 1024  ;;  %p1873_p0 = scmp.lt.s32.totalorder %s2587_s16, %s1871_s24 }
 0x368   : > { %v1324_v50 = vadd.f32 %v1308_v44, %v1292_v43  ;;  %v1606_v53 = vpack.c.bf16 %v1342_v49, %v1341_v48  ;;  %v1339_v57 = vmax.f32 %v1323_v63, 0.0  ;;  %p1867_p11 = scmp.ne.s32.totalorder %s2587_s16, %s1866_s13  ;;  %p1874_p1 = scmp.lt.s32.totalorder %s1872_s23, %s1866_s13 }
 0x36a   : > { %v1340_v20 = vmax.f32 %v1324_v50, 0.0  ;;  %1622 = vst [vmem:[%s2494_s27 + $0x28] sm:$0xff] %v1606_v53   ;;  %p1868_p12 = pnand %p1867_p11, %p2021_p5  ;;  %p1875_p2 = por %p1874_p1, %p1873_p0 }
 0x36b   : > { %v1851_v17 = vpop.eup %1850 }
 0x36c   : > { %v1601_v6 = vpack.c.bf16 %v1340_v20, %v1339_v57  ;;  %v1251_v46 = vmul.f32 %v1851_v17, %v1203_v7  ;;  %p1869_p13 = pneg %p1868_p12 }
 0x36d   : > { %v1853_v15 = vpop.eup %1852 }
 0x36e   : > { %1621 = vst [vmem:[%s2494_s27 + $0x20] sm:$0xff] %v1601_v6   ;;  %v1273_v11 = vmul.f32 %v2453_v5, %v1251_v46  ;;  %v1252_v16 = vmul.f32 %v1853_v15, %v1204_v9  ;;  %p1876_p3 = pnand %p1875_p2, %p1869_p13 }
 0x36f   : > { %v1855_v47 = vpop.eup %1854 }
 0x370   : > { %v1295_v54 = vadd.f32 %v2463_v32, %v1273_v11  ;;  %v1274_v13 = vmul.f32 %v2453_v5, %v1252_v16  ;;  %v1253_v22 = vmul.f32 %v1855_v47, %v1205_v12 }
 0x371   : > { %v1857_v45 = vpop.eup %1856 }
 0x372   : > { %v1327_v27 = vadd.f32 %v1311_v31, %v1295_v54  ;;  %v1296_v30 = vadd.f32 %v2463_v32, %v1274_v13  ;;  %v1275_v18 = vmul.f32 %v2453_v5, %v1253_v22  ;;  %v1254_v40 = vmul.f32 %v1857_v45, %v1206_v56 }
 0x374   : > { %v1328_v26 = vadd.f32 %v1312_v33, %v1296_v30  ;;  %v1297_v59 = vadd.f32 %v2463_v32, %v1275_v18  ;;  %v1276_v28 = vmul.f32 %v2453_v5, %v1254_v40  ;;  %v1343_v19 = vmax.f32 %v1327_v27, 0.0 }
 0x376   : > { %v1344_v52 = vmax.f32 %v1328_v26, 0.0  ;;  %v1329_v23 = vadd.f32 %v1313_v3, %v1297_v59  ;;  %v1298_v0 = vadd.f32 %v2463_v32, %v1276_v28 }
 0x378   : > { %v1611_v10 = vpack.c.bf16 %v1344_v52, %v1343_v19  ;;  %v1330_v24 = vadd.f32 %v1314_v35, %v1298_v0  ;;  %v1345_v34 = vmax.f32 %v1329_v23, 0.0 }
 0x37a   : > { %1623 = vst [vmem:[%s2494_s27 + $0x30] sm:$0xff] %v1611_v10   ;;  %v1346_v8 = vmax.f32 %v1330_v24, 0.0 }
 0x37c   : > { %v1616_v5 = vpack.c.bf16 %v1346_v8, %v1345_v34 }
 0x37e   : > { %1624 = vst [vmem:[%s2494_s27 + $0x38] sm:$0xff] %v1616_v5  }
 0x37f   : > { %1879 = shalt.err (!%p1876_p3)
}
 0x380   : > { %s1880_s25 = scalar_lea.hbm %s2585_s17, 1024  ;;  %s1884_s28 = scalar_lea.hbm %s2642_s9, 2048 }
 0x381   : > { %p1881_p4 = scmp.ne.s32.totalorder %s2585_s17, %s1880_s25  ;;  %p1885_p9 = scmp.lt.u32.totalorder %s2585_s17, %s2642_s9 }
 0x382   : > { %p1886_p10 = scmp.lt.u32.totalorder %s1884_s28, %s1880_s25  ;;  %p1888_p12 = scmp.lt.u32.totalorder %s1880_s25, %s2585_s17 }
 0x383   : > { %p1882_p7 = pnand %p1881_p4, %p2021_p5 }
 0x384   : > { %p1887_p11 = por %p1886_p10, %p1885_p9 }
 0x385   : > { %p1883_p8 = pneg %p1882_p7 }
 0x386   : > { %p1889_p13 = por %p1888_p12, %p1887_p11 }
 0x388   : > { %p1890_p0 = pnand %p1889_p13, %p1883_p8 }
 0x38a   : > { %1893 = shalt.err (!%p1890_p0)
}
 0x38b   : > { %s1931_s13 = smov 64   ;;  %s1932_s22 = smov 4  }
 0x38c   : > { %1721 = dma.vmem_to_hbm [thread:$0]  (%p2021_p5), %s2587_s16, 1024, %s2585_s17, %s2592_s21, %s1931_s13, %s1931_s13, %s1932_s22  }
 0x38d PF: > { %p1727_p1 = scmp.ge.s32.totalorder %s1928_s12, 2  ;;  %s1456_s24 = sand.u32 1, %s1916_s30  }
 0x38e   : > { %s1457_s23 = scalar_lea.sflag [#allocation3], %s1456_s24 }
 0x38f   : > { %p1724_p2 = pnand %p1727_p1, %p2025_p6 }
 0x391   : > { %1911 = dma.done.wait (!%p1724_p2), %s1457_s23, 1024  }
 0x392   : > { %1913 = vsyncadd (!%p1724_p2), %s1457_s23, 4294966272  ;;  %p19_p3 = scmp.ge.s32.totalorder %s2008_s15, 4   ;;  %s2645_s30 = smov %s1920_s10 }
 0x393   : > { %s2646_s10 = smov %s1924_s11  ;;  %s2647_s11 = smov %s2019_s18 }
 0x394   : > { %s2648_s12 = smov %s2008_s15  ;;  %21 = sbr.rel (!%p19_p3) target bundleno = 3 (0x3), region = 91 }
 0x39b   :  { %1462 = vsyncpa [#allocation3], 1 }
 0x39c   :  { %1464 = vsyncpa [#allocation3 + $0x1], 1 }

</bundles_post_ra>
